<compile_context>
chip_gen: v7x
topology: tpu7x:2x2x1
jax: 0.10.0
libtpu: 0.0.40
codegen_flags: <defaults>
</compile_context>

<pallas_src>
import jax
import jax.numpy as jnp
from jax.experimental import pallas as pl
from jax.experimental.pallas import tpu as pltpu

_LANE = 128
_SUBLANE = 8
_TILE_BYTES = 4 << 20  # ~4 MiB per input tile


def _sigmoid_kernel(x_ref, o_ref):
    # Elementwise sigmoid on the whole VMEM tile; compute in f32, store back
    # in the original dtype.
    x = x_ref[...].astype(jnp.float32)
    o_ref[...] = jax.nn.sigmoid(x).astype(o_ref.dtype)


def _pick_cols(n):
    # Widest lane-dense column count c (multiple of 128) such that
    # n == rows * c with rows a multiple of 8 (i.e. 8*c divides n).
    for c in (4096, 2048, 1024, 512, 256, _LANE):
        if n % (_SUBLANE * c) == 0:
            return c
    return None


def liyong_forward(x):
    """Forward of `Liyong`: elementwise sigmoid via a Pallas TPU kernel."""
    orig_shape = x.shape
    flat = x.reshape(-1)
    n = flat.size

    cols = _pick_cols(n)
    if cols is None:
        # Unaligned size: pad up to a multiple of 8*128 (a valid width then
        # always exists, 128 at minimum), slice the result back afterwards.
        base = _SUBLANE * _LANE
        padded = ((n + base - 1) // base) * base
        flat = jnp.pad(flat, (0, padded - n))
        cols = _pick_cols(padded)
        rows = padded // cols
    else:
        rows = n // cols

    x2d = flat.reshape(rows, cols)

    # Rows per tile: ~_TILE_BYTES per block, multiple of 8, clamped to `rows`.
    itemsize = jnp.dtype(x.dtype).itemsize
    tile_rows = max(
        _SUBLANE, (_TILE_BYTES // (cols * itemsize)) // _SUBLANE * _SUBLANE
    )
    tile_rows = min(tile_rows, rows)

    grid = (pl.cdiv(rows, tile_rows),)

    out = pl.pallas_call(
        _sigmoid_kernel,
        out_shape=jax.ShapeDtypeStruct((rows, cols), x.dtype),
        grid_spec=pltpu.PrefetchScalarGridSpec(
            num_scalar_prefetch=0,
            grid=grid,
            in_specs=[pl.BlockSpec((tile_rows, cols), lambda i: (i, 0))],
            out_specs=pl.BlockSpec((tile_rows, cols), lambda i: (i, 0)),
        ),
        compiler_params=pltpu.CompilerParams(
            # Parallel grid lets v7x split steps across its 2 TensorCores;
            # harmless no-op on single-TC v5e/v6e.
            dimension_semantics=("parallel",),
            # Above v5e's 16 MiB default scoped limit, below v7x's 64 MiB
            # physical VMEM; actual use ~4x tile bytes (double-buffered
            # in + out) ~= 16 MiB.
            vmem_limit_bytes=48 << 20,
        ),
    )(x2d)

    out_flat = out.reshape(-1)
    if out_flat.size != n:
        out_flat = out_flat[:n]
    return out_flat.reshape(orig_shape)


if __name__ == "__main__":
    key = jax.random.PRNGKey(0)

    # Small NCHW input consistent with the module's usage (image-like batch).
    x = jax.random.normal(key, (2, 4, 16, 16), dtype=jnp.float32)
    y = jax.block_until_ready(liyong_forward(x))
    y_ref = jax.nn.sigmoid(x)
    assert y.shape == x.shape and y.dtype == x.dtype
    assert jnp.allclose(y, y_ref, atol=1e-6, rtol=1e-6)

    # Exercise the multi-block path with a partial last block (rows not a
    # multiple of tile_rows) and no wrapper-side padding needed.
    key2 = jax.random.PRNGKey(1)
    x_big = jax.random.normal(key2, (8, 16, 129, 128), dtype=jnp.float32)
    y_big = jax.block_until_ready(liyong_forward(x_big))
    assert y_big.shape == x_big.shape and y_big.dtype == x_big.dtype
    assert jnp.allclose(y_big, jax.nn.sigmoid(x_big), atol=1e-6, rtol=1e-6)

    # Exercise the pad + slice fallback (odd element count) and bf16.
    x_odd = jax.random.normal(jax.random.PRNGKey(2), (3, 5, 7), dtype=jnp.bfloat16)
    y_odd = jax.block_until_ready(liyong_forward(x_odd))
    assert y_odd.shape == x_odd.shape and y_odd.dtype == x_odd.dtype
    assert jnp.allclose(
        y_odd.astype(jnp.float32),
        jax.nn.sigmoid(x_odd.astype(jnp.float32)),
        atol=2e-2, rtol=2e-2,
    )

    print("KERNEL_OK")
</pallas_src>

<mosaic_0001>
module attributes {stable_mosaic.version = 11 : i64} {
  func.func @_sigmoid_kernel(%arg0: i32, %arg1: memref<8x256xf32, #tpu.memory_space<vmem>>, %arg2: memref<8x256xf32, #tpu.memory_space<vmem>>) attributes {dimension_semantics = [#tpu.dimension_semantics<parallel>], iteration_bounds = array<i64: 1>, scalar_prefetch = 0 : i64, scratch_operands = 0 : i64, tpu.core_type = #tpu.core_type<tc>, window_params = [{transform_indices = @transform_0, window_bounds = array<i64: 8, 256>}, {transform_indices = @transform_1, window_bounds = array<i64: 8, 256>}]} {
    %c0 = arith.constant 0 : index
    %c0_0 = arith.constant 0 : index
    %0 = vector.load %arg1[%c0, %c0_0] : memref<8x256xf32, #tpu.memory_space<vmem>>, vector<8x256xf32>
    %1 = arith.negf %0 : vector<8x256xf32>
    %2 = math.exp %1 : vector<8x256xf32>
    %cst = arith.constant 1.000000e+00 : f32
    %3 = vector.broadcast %cst : f32 to vector<8x256xf32>
    %4 = arith.addf %3, %2 : vector<8x256xf32>
    %5 = arith.divf %3, %4 : vector<8x256xf32>
    %c0_1 = arith.constant 0 : index
    %c0_2 = arith.constant 0 : index
    %6 = vector.load %arg2[%c0_1, %c0_2] : memref<8x256xf32, #tpu.memory_space<vmem>>, vector<8x256xf32>
    tpu.vector_store %arg2[%c0_1, %c0_2], %5 {strides = array<i32>} : memref<8x256xf32, #tpu.memory_space<vmem>>, vector<8x256xf32>,
    return
  }
  func.func @transform_0(%arg0: i32) -> (i32, i32) {
    %c0_i32 = arith.constant 0 : i32
    %c0_i32_0 = arith.constant 0 : i32
    return %arg0, %c0_i32 : i32, i32
  }
  func.func @transform_1(%arg0: i32) -> (i32, i32) {
    %c0_i32 = arith.constant 0 : i32
    %c0_i32_0 = arith.constant 0 : i32
    return %arg0, %c0_i32 : i32, i32
  }
}

</mosaic_0001>

<bundles_post_ra>
// kernel: tpu_custom_call.1
= control target key start
LH: loop header
LB: loop body
LE: loop exit
PB: predicated region body
PF: predicated region fallthrough
CT: control target
= control target key end

     0   :  { %6 = vsyncpa [#allocation3], 0  ;;  %s148_s0 = inlined_call_operand.hbm [shape: f32[8,256], index: 0, kind: input, shape index: {}]   ;;  %s149_s1 = inlined_call_operand.hbm [shape: f32[8,256], index: 1, kind: output, shape index: {}]  }
   0x1   :  { %7 = vsyncpa [#allocation4], 0  ;;  %s112_s6 = smov [#allocation2]   ;;  %s64_s10 = scalar_lea.hbm %s148_s0, 256 }
   0x2   :  { %s14_s7 = sshll.u32 %s112_s6, 4  ;;  %p65_p0 = scmp.ne.s32.totalorder %s148_s0, %s64_s10  ;;  %s15_s7 = int_to_ptr.vmem [resolvable:$true] %s14_s7 }
   0x3   :  { %p68_p1 = scmp.lt.u32.totalorder %s64_s10, %s148_s0 }
   0x5   :  { %p70_p2 = pnand %p68_p1, %p65_p0 }
   0x7   :  { %73 = shalt.err (!%p70_p2)
}
   0x8   :  { %s74_s15 = scalar_lea.vmem %s15_s7, 256  ;;  %p79_p4 = scmp.lt.s32.totalorder %s15_s7, %s15_s7 }
   0x9   :  { %p75_p3 = scmp.ne.s32.totalorder %s15_s7, %s74_s15  ;;  %p80_p5 = scmp.lt.s32.totalorder %s74_s15, %s74_s15 }
   0xb   :  { %p81_p6 = por %p80_p5, %p79_p4 }
   0xd   :  { %p82_p7 = pnand %p81_p6, %p75_p3 }
   0xf   :  { %85 = shalt.err (!%p82_p7)
}
  0x10   :  { %17 = dma.hbm_to_vmem [thread:$0]  %s148_s0, 256, %s15_s7, [#allocation3]  }
  0x11   :  { %108 = dma.done.wait [#allocation3], 256  }
  0x12   :  { %109 = vsyncadd [#allocation3], 4294967040  ;;  %v21_v0 = vld [vmem:[#allocation2] sm:$0xff]  ;;  %v22_v1 = vld [vmem:[#allocation2 + $0x8] sm:$0xff]  ;;  %s113_s18 = smov [#allocation5]  }
  0x13   :  { %v52_v2 = vmul.f32 -1.442695, %v21_v0  ;;  %v53_v3 = vmul.f32 -1.442695, %v22_v1  ;;  %s43_s19 = sshll.u32 %s113_s18, 4  ;;  %s44_s19 = int_to_ptr.vmem [resolvable:$true] %s43_s19 }
  0x14   :  { %s86_s0 = scalar_lea.vmem %s44_s19, 256  ;;  %p91_p9 = scmp.lt.s32.totalorder %s44_s19, %s44_s19 }
  0x15   :  { %56 = vpow2.f32 %v52_v2  ;;  %p87_p8 = scmp.ne.s32.totalorder %s44_s19, %s86_s0  ;;  %p92_p10 = scmp.lt.s32.totalorder %s86_s0, %s86_s0 }
  0x16   :  { %58 = vpow2.f32 %v53_v3 }
  0x17   :  { %p93_p11 = por %p92_p10, %p91_p9 }
  0x19   :  { %p94_p12 = pnand %p93_p11, %p87_p8 }
  0x1f   :  { %v57_v4 = vpop.eup %56 }
  0x20   :  { %v59_v5 = vpop.eup %58  ;;  %v29_v6 = vadd.f32 1.0, %v57_v4 }
  0x21   :  { %v30_v7 = vadd.f32 1.0, %v59_v5 }
  0x22   :  { %60 = vrcp.f32 %v29_v6 }
  0x23   :  { %62 = vrcp.f32 %v30_v7 }
  0x2c   :  { %v61_v8 = vpop.eup %60 }
  0x2d   :  { %v63_v9 = vpop.eup %62  ;;  %35 = vst [vmem:[#allocation5] sm:$0xff] %v61_v8 }
  0x2e   :  { %36 = vst [vmem:[#allocation5 + $0x8] sm:$0xff] %v63_v9 }
  0x2f   :  { %97 = shalt.err (!%p94_p12)
}
  0x30   :  { %s98_s22 = scalar_lea.hbm %s149_s1, 256 }
  0x31   :  { %p99_p13 = scmp.ne.s32.totalorder %s149_s1, %s98_s22  ;;  %p102_p0 = scmp.lt.u32.totalorder %s98_s22, %s149_s1 }
  0x33   :  { %p104_p1 = pnand %p102_p0, %p99_p13 }
  0x35   :  { %107 = shalt.err (!%p104_p1)
}
  0x36   :  { %46 = dma.vmem_to_hbm [thread:$0]  %s44_s19, 256, %s149_s1, [#allocation4]  }
  0x37   :  { %110 = dma.done.wait [#allocation4], 256  }
  0x38   :  { %111 = vsyncadd [#allocation4], 4294967040 }
  0x39   :  { %50 = vsyncpa [#allocation3], 1 }
  0x3a   :  { %51 = vsyncpa [#allocation4], 1 }

</bundles_post_ra>
